<compile_context>
chip_gen: v5e
topology: v5e:2x2
jax: 0.10.0
libtpu: 0.0.40
codegen_flags: <defaults>
</compile_context>

<pallas_src>
import math

import jax
import jax.numpy as jnp
from jax.experimental import pallas as pl
from jax.experimental.pallas import tpu as pltpu


_MAX_TM = 1024  # max point-tile width (lanes); always a multiple of 128


def _round_up(n, m):
    return ((n + m - 1) // m) * m


def _equiv_vector_kernel(x_ref, at_ref, const_ref, o_ref):
    # x_ref    : (1, Fin, TM)   one (batch, point-tile) block, channel-major
    # at_ref   : (Fout, Fin)    per-point channel-mixing matrix (transposed)
    # const_ref: (1, Fout, 1)   f32 precomputed mean-term + bias for this batch elem
    # o_ref    : (1, Fout, TM)  lane-dense output block
    out = jnp.dot(at_ref[...], x_ref[0], preferred_element_type=jnp.float32)  # (Fout, TM)
    out = out + const_ref[0]                       # (Fout, 1) broadcasts over lanes
    o_ref[0] = out.astype(o_ref.dtype)


def _equiv_vector_pallas(x_cm, a_t, const, tm):
    B, Fin, Mp = x_cm.shape
    Fout = a_t.shape[0]
    grid = (B, Mp // tm)
    return pl.pallas_call(
        _equiv_vector_kernel,
        out_shape=jax.ShapeDtypeStruct((B, Fout, Mp), x_cm.dtype),
        grid_spec=pltpu.PrefetchScalarGridSpec(
            num_scalar_prefetch=0,
            grid=grid,
            in_specs=[
                pl.BlockSpec((1, Fin, tm), lambda b, m: (b, 0, m)),
                pl.BlockSpec((Fout, Fin), lambda b, m: (0, 0)),
                pl.BlockSpec((1, Fout, 1), lambda b, m: (b, 0, 0)),
            ],
            out_specs=pl.BlockSpec((1, Fout, tm), lambda b, m: (b, 0, m)),
        ),
        compiler_params=pltpu.CompilerParams(
            dimension_semantics=("parallel", "parallel"),
            vmem_limit_bytes=32 * 1024 * 1024,  # tiles are tiny; safe on v5e/v6e/v7x
        ),
    )(x_cm, a_t, const)


class EquivVectorLayer:
    """JAX/Pallas port of the PyTorch EquivVectorLayer.

    __call__               : (B, Cin, M, 2)  -> (B, Cout, M, 2)   (PyTorch layout)
    forward_channel_major  : (B, 2*Cin, M)   -> (B, 2*Cout, M)    (flat layout, no
                             boundary transposes -- use between stacked layers)
    """

    def __init__(self, nbr_in_chan, nbr_out_chan, complex_weights=False,
                 full_weights=False, bias=False, weight_init_gain=1.0,
                 key=jax.random.PRNGKey(0)):
        self.nbr_in_chan = nbr_in_chan
        self.nbr_out_chan = nbr_out_chan
        self.mode = 'default'
        if full_weights:
            self.mode = 'full'
        elif complex_weights:
            self.mode = 'complex'
        self.bias_active = bias
        self.gain = weight_init_gain

        if self.mode == 'full':
            w_shape = (nbr_in_chan, nbr_out_chan, 2, 2, 2)
        elif self.mode == 'complex':
            w_shape = (nbr_in_chan, nbr_out_chan, 2, 2)
        else:
            w_shape = (nbr_in_chan, nbr_out_chan, 2)

        kw, kb = jax.random.split(key)
        # torch xavier_normal_: fan_in = size(1)*prod(dims[2:]), fan_out = size(0)*prod(dims[2:])
        recept = int(math.prod(w_shape[2:])) if len(w_shape) > 2 else 1
        fan_in, fan_out = w_shape[1] * recept, w_shape[0] * recept
        w_std = weight_init_gain * math.sqrt(2.0 / (fan_in + fan_out))
        self.weights = (w_std * jax.random.normal(kw, w_shape)).astype(jnp.float32)

        if self.bias_active:
            b_std = (weight_init_gain / 10.0) * math.sqrt(2.0 / (nbr_out_chan + 2))
            self.bias = (b_std * jax.random.normal(kb, (nbr_out_chan, 2))).astype(jnp.float32)
        else:
            self.bias = None

    def _mixing_matrices(self):
        """Build A^T (2*Cout, 2*Cin) for the per-point term, B (2*Cin, 2*Cout) for the
        mean term, and the flattened bias (or None)."""
        W = self.weights
        if self.mode == 'full':
            Aten = W[..., 0]                                    # (c, o, i, j)
            Bten = W[..., 1]
        elif self.mode == 'complex':
            a, b = W[:, :, 0, 0], W[:, :, 1, 0]                 # per-point complex a + i*b
            a2, b2 = W[:, :, 0, 1], W[:, :, 1, 1]               # mean-term complex scalar
            Aten = jnp.stack([jnp.stack([a, -b], axis=-1),
                              jnp.stack([b, a], axis=-1)], axis=-2)      # (c, o, i, j)
            Bten = jnp.stack([jnp.stack([a2, -b2], axis=-1),
                              jnp.stack([b2, a2], axis=-1)], axis=-2)
        else:
            eye2 = jnp.eye(2, dtype=W.dtype)
            Aten = W[..., 0][:, :, None, None] * eye2[None, None]        # (c, o, i, j)
            Bten = W[..., 1][:, :, None, None] * eye2[None, None]

        Cin, Cout = self.nbr_in_chan, self.nbr_out_chan
        a_t = jnp.transpose(Aten, (1, 2, 0, 3)).reshape(2 * Cout, 2 * Cin)  # [o*2+i, c*2+j]
        b_mat = jnp.transpose(Bten, (0, 3, 1, 2)).reshape(2 * Cin, 2 * Cout)  # [c*2+j, o*2+i]
        bias_flat = self.bias.reshape(2 * Cout) if self.bias_active else None
        return a_t, b_mat, bias_flat

    def forward_channel_major(self, x_cm):
        """x_cm: (B, 2*Cin, M) with feature index = channel*2 + component."""
        B, Fin, M = x_cm.shape
        a_t, b_mat, bias_flat = self._mixing_matrices()
        a_t = a_t.astype(x_cm.dtype)          # bf16 in -> bf16 x bf16 -> f32 on the MXU

        # Mean term (+ bias) precomputed once, in f32, as a tiny (B,Fin)@(Fin,Fout) op.
        xbar = jnp.mean(x_cm.astype(jnp.float32), axis=-1)          # (B, Fin)
        const = xbar @ b_mat.astype(jnp.float32)                    # (B, Fout)
        if bias_flat is not None:
            const = const + bias_flat[None, :].astype(jnp.float32)
        const = const[:, :, None]                                   # (B, Fout, 1)

        # Tile the point axis: TM multiple of 128 (lane-dense loads/stores).
        tm = min(_MAX_TM, _round_up(M, 128))
        Mp = _round_up(M, tm)
        if Mp != M:
            x_cm = jnp.pad(x_cm, ((0, 0), (0, 0), (0, Mp - M)))

        out_cm = _equiv_vector_pallas(x_cm, a_t, const, tm)         # (B, Fout, Mp)
        return out_cm[:, :, :M]

    def __call__(self, x):
        # x: (B, Cin, M, 2)  ->  (B, Cout, M, 2)
        B, Cin, M, _ = x.shape
        Cout = self.nbr_out_chan
        # layout plumbing only at the module boundary; stacked layers should use
        # forward_channel_major directly and skip these transposes.
        x_cm = jnp.transpose(x, (0, 1, 3, 2)).reshape(B, 2 * Cin, M)
        out_cm = self.forward_channel_major(x_cm)                   # (B, 2*Cout, M)
        out = out_cm.reshape(B, Cout, 2, M)
        return jnp.transpose(out, (0, 1, 3, 2))


def _reference_forward(layer, x):
    """Pure-JAX transcription of the original PyTorch forward (for verification)."""
    W = layer.weights
    xbar = x.mean(axis=2)                                            # (B, C, 2)
    if layer.mode == 'full':
        out = jnp.einsum('coij,bcmj->bomi', W[..., 0], x)
        out = out + jnp.einsum('coij,bcj->boi', W[..., 1], xbar)[:, :, None, :]
    elif layer.mode == 'complex':
        t = jnp.einsum('co,bcik->boik', W[..., 1, 0], x)
        t = t + jnp.einsum('co,bck->bok', W[..., 1, 1], xbar)[:, :, None, :]
        t = jnp.roll(t, 1, axis=-1)
        t = t.at[..., 0].multiply(-1.0)
        out = t + jnp.einsum('co,bcik->boik', W[..., 0, 0], x)
        out = out + jnp.einsum('co,bck->bok', W[..., 0, 1], xbar)[:, :, None, :]
    else:
        out = jnp.einsum('co,bcik->boik', W[..., 0], x)
        out = out + jnp.einsum('co,bck->bok', W[..., 1], xbar)[:, :, None, :]
    if layer.bias_active:
        out = out + layer.bias[None, :, None, :]
    return out


if __name__ == "__main__":
    key = jax.random.PRNGKey(0)
    k_x, k_w0, k_w1, k_w2 = jax.random.split(key, 4)

    B, Cin, Cout, M = 2, 4, 6, 16
    x = jax.random.normal(k_x, (B, Cin, M, 2), dtype=jnp.float32)

    configs = [
        dict(complex_weights=False, full_weights=False, bias=False, key=k_w0),
        dict(complex_weights=True, full_weights=False, bias=True, key=k_w1),
        dict(complex_weights=False, full_weights=True, bias=True, key=k_w2),
    ]

    for cfg in configs:
        layer = EquivVectorLayer(Cin, Cout, weight_init_gain=1.0, **cfg)
        out = jax.block_until_ready(layer(x))
        ref = _reference_forward(layer, x)
        assert out.shape == (B, Cout, M, 2), out.shape
        assert jnp.allclose(out, ref, atol=1e-5, rtol=1e-5), (
            f"mismatch in mode={layer.mode}: max err "
            f"{float(jnp.max(jnp.abs(out - ref)))}")

    # bf16 input path (input dtype is preserved; MXU runs bf16 x bf16 -> f32).
    layer_bf16 = EquivVectorLayer(Cin, Cout, full_weights=True, bias=True,
                                  weight_init_gain=1.0, key=k_w2)
    out_bf16 = jax.block_until_ready(layer_bf16(x.astype(jnp.bfloat16)))
    ref_bf16 = _reference_forward(layer_bf16, x)
    assert out_bf16.shape == (B, Cout, M, 2)
    assert jnp.allclose(out_bf16.astype(jnp.float32), ref_bf16, atol=1e-1, rtol=1e-1), (
        f"bf16 path too far from f32 reference: max err "
        f"{float(jnp.max(jnp.abs(out_bf16.astype(jnp.float32) - ref_bf16)))}")

    print("KERNEL_OK")
</pallas_src>

<mosaic_0001>
module attributes {stable_mosaic.version = 11 : i64} {
  func.func @_equiv_vector_kernel(%arg0: i32, %arg1: i32, %arg2: memref<1x8x128xf32, #tpu.memory_space<vmem>>, %arg3: memref<12x8xf32, #tpu.memory_space<vmem>>, %arg4: memref<1x12x1xf32, #tpu.memory_space<vmem>>, %arg5: memref<1x12x128xf32, #tpu.memory_space<vmem>>) attributes {dimension_semantics = [#tpu.dimension_semantics<parallel>, #tpu.dimension_semantics<parallel>], iteration_bounds = array<i64: 2, 1>, scalar_prefetch = 0 : i64, scratch_operands = 0 : i64, tpu.core_type = #tpu.core_type<tc>, window_params = [{transform_indices = @transform_0, window_bounds = array<i64: 1, 8, 128>}, {pipeline_mode = #tpu.pipeline_mode<synchronous>, transform_indices = @transform_1, window_bounds = array<i64: 12, 8>}, {transform_indices = @transform_2, window_bounds = array<i64: 1, 12, 1>}, {transform_indices = @transform_3, window_bounds = array<i64: 1, 12, 128>}]} {
    %c0 = arith.constant 0 : index
    %c0_0 = arith.constant 0 : index
    %0 = vector.load %arg3[%c0, %c0_0] : memref<12x8xf32, #tpu.memory_space<vmem>>, vector<12x8xf32>
    %c0_1 = arith.constant 0 : index
    %c0_2 = arith.constant 0 : index
    %c0_3 = arith.constant 0 : index
    %1 = vector.load %arg2[%c0_1, %c0_2, %c0_3] : memref<1x8x128xf32, #tpu.memory_space<vmem>>, vector<1x8x128xf32>
    %2 = vector.shape_cast %1 : vector<1x8x128xf32> to vector<8x128xf32>
    %cst = arith.constant dense<0.000000e+00> : vector<12x128xf32>
    %3 = tpu.matmul %0, %2, %cst {dimension_numbers = #tpu.dot_dimension_numbers<[1], [0], [0], [1], [0, 0, 1, 1], [], []>} : vector<12x8xf32>, vector<8x128xf32>, vector<12x128xf32> -> vector<12x128xf32>
    %c0_4 = arith.constant 0 : index
    %c0_5 = arith.constant 0 : index
    %c0_6 = arith.constant 0 : index
    %4 = vector.load %arg4[%c0_4, %c0_5, %c0_6] : memref<1x12x1xf32, #tpu.memory_space<vmem>>, vector<1x12x1xf32>
    %5 = vector.shape_cast %4 : vector<1x12x1xf32> to vector<12x1xf32>
    %6 = vector.broadcast %5 : vector<12x1xf32> to vector<12x128xf32>
    %7 = arith.addf %3, %6 : vector<12x128xf32>
    %c0_7 = arith.constant 0 : index
    %c0_8 = arith.constant 0 : index
    %c0_9 = arith.constant 0 : index
    %8 = vector.load %arg5[%c0_7, %c0_8, %c0_9] : memref<1x12x128xf32, #tpu.memory_space<vmem>>, vector<1x12x128xf32>
    %9 = vector.shape_cast %8 : vector<1x12x128xf32> to vector<12x128xf32>
    %10 = vector.shape_cast %7 : vector<12x128xf32> to vector<1x12x128xf32>
    tpu.vector_store %arg5[%c0_7, %c0_8, %c0_9], %10 {strides = array<i32>} : memref<1x12x128xf32, #tpu.memory_space<vmem>>, vector<1x12x128xf32>,
    return
  }
  func.func @transform_0(%arg0: i32, %arg1: i32) -> (i32, i32, i32) {
    %c0_i32 = arith.constant 0 : i32
    %c0_i32_0 = arith.constant 0 : i32
    return %arg0, %c0_i32, %arg1 : i32, i32, i32
  }
  func.func @transform_1(%arg0: i32, %arg1: i32) -> (i32, i32) {
    %c0_i32 = arith.constant 0 : i32
    %c0_i32_0 = arith.constant 0 : i32
    %c0_i32_1 = arith.constant 0 : i32
    return %c0_i32, %c0_i32_0 : i32, i32
  }
  func.func @transform_2(%arg0: i32, %arg1: i32) -> (i32, i32, i32) {
    %c0_i32 = arith.constant 0 : i32
    %c0_i32_0 = arith.constant 0 : i32
    %c0_i32_1 = arith.constant 0 : i32
    return %arg0, %c0_i32, %c0_i32_0 : i32, i32, i32
  }
  func.func @transform_3(%arg0: i32, %arg1: i32) -> (i32, i32, i32) {
    %c0_i32 = arith.constant 0 : i32
    %c0_i32_0 = arith.constant 0 : i32
    return %arg0, %c0_i32, %arg1 : i32, i32, i32
  }
}

</mosaic_0001>

<bundles_post_ra>
// kernel: tpu_custom_call.1
= control target key start
LH: loop header
LB: loop body
LE: loop exit
PB: predicated region body
PF: predicated region fallthrough
CT: control target
= control target key end

     0   :  { %s446_s12 = smov 0   ;;  %s448_s13 = smov 0   ;;  %s488_s0 = inlined_call_operand.vmem [shape: f32[2,8,128], index: 0, kind: input, shape index: {}]   ;;  %s489_s1 = inlined_call_operand.vmem [shape: f32[12,8], index: 1, kind: input, shape index: {}]   ;;  %s490_s2 = inlined_call_operand.vmem [shape: f32[2,12,1], index: 2, kind: input, shape index: {}]   ;;  %s491_s3 = inlined_call_operand.vmem [shape: f32[2,12,128], index: 3, kind: output, shape index: {}]  }
   0x1   :  { %s450_s14 = smov 0  }
   0x2 LB: > { %s25_s15 = sadd.s32 1, %s419_s13  ;;  %p362_p0 = scmp.ge.s32.totalorder %s423_s14, 1  ;;  %s423_s14 = sphi %s450_s14, %s13_s14   ;;  %s419_s13 = sphi %s448_s13, %s493_s13   ;;  %s415_s12 = sphi %s446_s12, %s492_s12  }
   0x3   : > { %p27_p1 = scmp.ge.s32.totalorder %s25_s15, 2  ;;  %p165_p2 = scmp.lt.s32.totalorder %s423_s14, 3 }
   0x5   : > { %s495_s15 = smov (%p27_p1, %s25_s15), 0  ;;  %p166_p3 = pnand %p362_p0, %p165_p2 }
   0x6   : > { %p199_p4 = scmp.lt.s32.totalorder (!%p166_p3), %s415_s12, 1 }
   0x7   : > { %169 = sbr.rel (%p166_p3) target bundleno = 148 (0x94), region = 32 }
   0xc   : > { %v425_v0 = vmov 0   ;;  %s497_s12 = smov (!%p199_p4, %s415_s12), 1  ;;  %v219_v1 = vld [vmem:[%s489_s1] sm:$0xff]  ;;  %vm234_vm0 = vcmask 64512   ;;  %v220_v4 = vld [vmem:[%s489_s1 + $0x8] sm:$0xf] }
   0xd   : > { %400 = vset.pattern.permute.xlu0 %v425_v0  ;;  %s372_s16 = sshll.u32 %s497_s12, 4  ;;  %s363_s17 = sshll.u32 %s497_s12, 3 }
   0xe   : > { %s210_s20 = scalar_lea.vmem %s490_s2, %s372_s16  ;;  %s205_s23 = scalar_lea.vmem %s488_s0, %s363_s17 }
   0xf   : > { %v222_v2 = vld [vmem:[%s210_s20] sm:$0xff]  ;;  %v223_v5 = vld [vmem:[%s210_s20 + $0x8] sm:$0xf]  ;;  %s218_s30 = scalar_lea.vmem %s491_s3, %s372_s16 }
  0x10   : > { %v221_v3 = vld [vmem:[%s205_s23] sm:$0xff]  ;;  %226 = vperm.xlu0 %400, %v222_v2  }
  0x11   : > { %256 = vmatpush.msra.mxu0 %v221_v3  ;;  %374 = vmatpush.msra.mxu1 %v221_v3 }
  0x12   : > { %368 = vmatmul.msk.f32.vlgmr.msra.gmra.mxu0 %vm234_vm0, %v219_v1  ;;  %369 = vmatmul.msk.f32.vlgmr.msra.gmra.mxu1 %vm234_vm0, %v220_v4 }
  0x18   : > { %231 = vperm.xlu0 %400, %v223_v5  }
  0x82   : > { %v227_v6 = vpop.permute.xlu0 %226 }
  0x8a   : > { %v232_v8 = vpop.permute.xlu0 %231 }
  0x8f   : > { %v258_v7 = vpop.f32.mrf.mxu0  ;;  %v261_v10 = vpop.f32.mrf.mxu1 }
  0x90   : > { %v259_v9 = vadd.f32 %v258_v7, %v227_v6  ;;  %v262_v11 = vadd.f32 %v261_v10, %v232_v8 }
  0x92   : > { %264 = vst [vmem:[%s218_s30] sm:$0xff] %v259_v9 }
  0x93   : > { %265 = vst [vmem:[%s218_s30 + $0x8] sm:$0xf] %v262_v11 }
  0x94 PF: > { %s13_s14 = sadd.s32 1, %s423_s14   ;;  %s492_s12 = smov %s419_s13 }
  0x95   : > { %p10_p5 = scmp.ge.s32.totalorder %s13_s14, 4   ;;  %s493_s13 = smov %s495_s15 }
  0x97   :  { %12 = sbr.rel (!%p10_p5) target bundleno = 2 (0x2), region = 65 }

</bundles_post_ra>
